<compile_context>
chip_gen: v7x
topology: tpu7x:2x2x1
jax: 0.10.0
libtpu: 0.0.40
codegen_flags: <defaults>
</compile_context>

<pallas_src>
import functools

import jax
import jax.numpy as jnp
from jax.experimental import pallas as pl
from jax.experimental.pallas import tpu as pltpu

LANES = 128
GRANULE = 16 * LANES          # zero-copy alignment granule (2048 elements)
TILE_R = 4096                 # rows per block: 4096*128*4 B = 2 MiB per f32 tile
SUB_R_CANDIDATES = (128, 64, 32, 16, 8)   # inner-chunk rows (must divide tile_r)


def _ceil_div(a, b):
    return -(-a // b)


@functools.lru_cache(maxsize=None)
def _num_tensorcores():
    """Best-effort TensorCore-per-chip count; default 1 (safe on v5e/v6e)."""
    try:
        info = pltpu.get_tpu_info()
    except Exception:
        return 1
    for name in ("num_cores", "core_count", "num_tensorcores",
                 "cores_per_chip", "num_cores_per_chip", "tensorcores_per_chip"):
        v = getattr(info, name, None)
        if isinstance(v, int) and not isinstance(v, bool) and 1 <= v <= 8:
            return v
    return 1


def _make_reduce_kernel(tile_r, sub_r, rows_total, bpc, blocks_total,
                        has_target, need_mask):
    """Kernel accumulating sum(|v|) and sum(v^2), v = x - t (or v = x)."""
    steps = tile_r // sub_r
    groups = sub_r // 8

    def accumulate(x_ref, t_ref, abs_ref, sq_ref, rows_rem):
        # rows_rem is None on the unmasked fast path; otherwise a traced scalar
        # giving the number of valid rows left in this tile (<= 0 for the
        # clamped overflow iteration -> everything masked to zero).
        def step(s, carry):
            a_acc, s_acc = carry
            off = pl.multiple_of(s * sub_r, sub_r)
            v = x_ref[pl.ds(off, sub_r), :].astype(jnp.float32)
            if has_target:
                v = v - t_ref[pl.ds(off, sub_r), :].astype(jnp.float32)
            if rows_rem is not None:
                row = off + jax.lax.broadcasted_iota(jnp.int32, (sub_r, LANES), 0)
                # Mask BEFORE abs/square so garbage rows (possibly NaN/Inf in
                # the ragged region) never reach the accumulators; jnp.where
                # does not propagate the unselected branch.
                v = jnp.where(row < rows_rem, v, 0.0)
            va = jnp.abs(v).reshape(groups, 8, LANES)
            vs = (v * v).reshape(groups, 8, LANES)
            return (a_acc + jnp.sum(va, axis=0), s_acc + jnp.sum(vs, axis=0))

        zero = jnp.zeros((8, LANES), jnp.float32)
        a, s = jax.lax.fori_loop(0, steps, step, (zero, zero))
        abs_ref[...] = abs_ref[...] + a[None]
        sq_ref[...] = sq_ref[...] + s[None]

    def body(x_ref, t_ref, abs_ref, sq_ref):
        c = pl.program_id(0)
        i = pl.program_id(1)

        @pl.when(i == 0)
        def _():
            abs_ref[...] = jnp.zeros_like(abs_ref)
            sq_ref[...] = jnp.zeros_like(sq_ref)

        if need_mask:
            gb = c * bpc + i                      # global block index

            @pl.when(gb < blocks_total - 1)        # interior tiles: no mask cost
            def _():
                accumulate(x_ref, t_ref, abs_ref, sq_ref, None)

            @pl.when(gb >= blocks_total - 1)       # last real block / overflow
            def _():
                rows_rem = rows_total - gb * tile_r
                accumulate(x_ref, t_ref, abs_ref, sq_ref, rows_rem)
        else:
            accumulate(x_ref, t_ref, abs_ref, sq_ref, None)

    if has_target:
        def kernel(x_ref, t_ref, abs_ref, sq_ref):
            body(x_ref, t_ref, abs_ref, sq_ref)
    else:
        def kernel(x_ref, abs_ref, sq_ref):
            body(x_ref, None, abs_ref, sq_ref)
    return kernel


def _pallas_abs_sq(x2d, t2d=None):
    """Streaming reduction -> (sum|v|, sum v^2), v = x - t or v = x. x2d: [R,128]."""
    rows = x2d.shape[0]
    tile_r = min(TILE_R, rows)
    sub_r = next(s for s in SUB_R_CANDIDATES if tile_r % s == 0)
    blocks_total = _ceil_div(rows, tile_r)
    nc = min(_num_tensorcores(), blocks_total)
    bpc = _ceil_div(blocks_total, nc)
    need_mask = (nc * bpc * tile_r != rows)
    has_target = t2d is not None

    def in_map(c, i):
        # Clamp the tail core's overflow iteration onto the last real block;
        # its contribution is fully masked to zero inside the kernel.
        return (jnp.minimum(c * bpc + i, blocks_total - 1), 0)

    in_specs = [pl.BlockSpec((tile_r, LANES), in_map)]
    operands = [x2d]
    if has_target:
        in_specs.append(pl.BlockSpec((tile_r, LANES), in_map))
        operands.append(t2d)

    out_spec = pl.BlockSpec((1, 8, LANES), lambda c, i: (c, 0, 0))
    out_shape = jax.ShapeDtypeStruct((nc, 8, LANES), jnp.float32)

    abs_part, sq_part = pl.pallas_call(
        _make_reduce_kernel(tile_r, sub_r, rows, bpc, blocks_total,
                            has_target, need_mask),
        out_shape=(out_shape, out_shape),
        grid_spec=pltpu.PrefetchScalarGridSpec(
            num_scalar_prefetch=0,
            grid=(nc, bpc),
            in_specs=in_specs,
            out_specs=[out_spec, out_spec],
        ),
        compiler_params=pltpu.CompilerParams(
            dimension_semantics=("parallel", "arbitrary"),
            vmem_limit_bytes=32 * 1024 * 1024,
        ),
    )(*operands)
    # Final cross-lane/sublane reduction of the lane-dense partials (wrapper side).
    return jnp.sum(abs_part), jnp.sum(sq_part)


def _streaming_abs_sq(x, t=None):
    """(sum|v|, sum v^2) with v = x - t (or v = x), streamed in native dtype.

    GRANULE-aligned prefix -> Pallas via a zero-copy [R,128] reshape (no pad);
    the (<GRANULE)-element tail, if any, is folded with plain jnp.
    """
    xf = jnp.ravel(x)
    tf = None if t is None else jnp.ravel(t)
    n = xf.shape[0]
    n_main = (n // GRANULE) * GRANULE

    abs_s = jnp.zeros((), jnp.float32)
    sq_s = jnp.zeros((), jnp.float32)
    if n_main:
        if n_main == n:                       # zero-copy path (common case)
            x2d = xf.reshape(-1, LANES)
            t2d = None if tf is None else tf.reshape(-1, LANES)
        else:
            x2d = xf[:n_main].reshape(-1, LANES)
            t2d = None if tf is None else tf[:n_main].reshape(-1, LANES)
        a, s = _pallas_abs_sq(x2d, t2d)
        abs_s = abs_s + a
        sq_s = sq_s + s
    if n_main < n:
        v = xf[n_main:].astype(jnp.float32)
        if tf is not None:
            v = v - tf[n_main:].astype(jnp.float32)
        abs_s = abs_s + jnp.sum(jnp.abs(v))
        sq_s = sq_s + jnp.sum(v * v)
    return abs_s, sq_s


@functools.partial(jax.jit, static_argnames=("loss_type", "regular_type"))
def custom_loss(prediction, target, loss_type="RMSE", loss_lambda=1.0,
                regular_type=None, regular_lambda=0.001, params=None):
    """JAX/Pallas port of Custom_LossFunction.forward (params == model.parameters())."""
    n_f = jnp.float32(prediction.size)
    abs_sum, sq_sum = _streaming_abs_sq(prediction, target)
    mae = abs_sum / n_f
    mse = sq_sum / n_f

    if loss_type == "RMSE":
        loss = jnp.sqrt(mse)
    elif loss_type == "MSE":
        loss = mse
    elif loss_type == "MAE":
        loss = mae
    elif loss_type == "MAE+MSE":
        loss = mae + loss_lambda * mse
    elif loss_type == "MAE+RMSE":
        loss = mae + loss_lambda * jnp.sqrt(mse)
    else:
        raise ValueError(f"Unsupported loss type: {loss_type}")

    if regular_type and params:
        if regular_type not in ("L1", "L2", "L1+L2"):
            raise ValueError(f"Unsupported regularization type: {regular_type}")
        # One native-dtype streaming reduction per parameter (no concat copy,
        # no dtype promotion, no peak-memory spike); scalars summed here.
        reg = jnp.zeros((), jnp.float32)
        for p in params:
            p_abs, p_sq = _streaming_abs_sq(p)
            if regular_type == "L1":
                reg = reg + p_abs
            elif regular_type == "L2":
                reg = reg + p_sq
            else:
                reg = reg + p_abs + p_sq
        return loss + regular_lambda * reg

    return loss


if __name__ == "__main__":
    key = jax.random.PRNGKey(0)
    k1, k2, k3, k4, k5, k6 = jax.random.split(key, 6)

    # Small NCHW-like predictions / targets (2048 elems -> zero-copy aligned path).
    prediction = jax.random.normal(k1, (2, 4, 16, 16), dtype=jnp.float32)
    target = jax.random.normal(k2, (2, 4, 16, 16), dtype=jnp.float32)

    # Synthetic "model parameters": a [64,32] weight (single-input Pallas path)
    # and a [4] bias (tiny -> folded in plain jnp).
    params = [
        jax.random.normal(k3, (64, 32), dtype=jnp.float32) * 0.1,
        jax.random.normal(k4, (4,), dtype=jnp.float32) * 0.1,
    ]

    # Exercise every reduction path: MAE + lambda*RMSE with L1+L2 penalty.
    loss = custom_loss(prediction, target,
                       loss_type="MAE+RMSE", loss_lambda=1.0,
                       regular_type="L1+L2", regular_lambda=0.001,
                       params=params)
    loss = jax.block_until_ready(loss)

    # Plain RMSE (no regularization) covers the other branch.
    loss2 = jax.block_until_ready(custom_loss(prediction, target, loss_type="RMSE"))

    # References (pure JAX).
    diff = prediction - target
    ref_mae = jnp.mean(jnp.abs(diff))
    ref_rmse = jnp.sqrt(jnp.mean(diff * diff))
    ref_reg = sum(jnp.sum(jnp.abs(p)) + jnp.sum(p * p) for p in params)
    ref = ref_mae + ref_rmse + 0.001 * ref_reg
    assert jnp.allclose(loss, ref, rtol=1e-5, atol=1e-5)
    assert jnp.allclose(loss2, ref_rmse, rtol=1e-5, atol=1e-5)

    # Unaligned numel: Pallas on the 2048-aligned prefix + jnp tail.
    pu = jax.random.normal(k5, (17, 129), dtype=jnp.float32)
    tu = jax.random.normal(k6, (17, 129), dtype=jnp.float32)
    lu = jax.block_until_ready(custom_loss(pu, tu, loss_type="MSE"))
    assert jnp.allclose(lu, jnp.mean((pu - tu) ** 2), rtol=1e-5, atol=1e-5)

    # Multi-block + ragged-last-block (masked) path: 4112 rows > TILE_R=4096.
    pm = jax.random.normal(k1, (4112, 128), dtype=jnp.float32)
    tm = jax.random.normal(k2, (4112, 128), dtype=jnp.float32)
    lm = jax.block_until_ready(
        custom_loss(pm, tm, loss_type="MAE+MSE", loss_lambda=0.5))
    ref_m = jnp.mean(jnp.abs(pm - tm)) + 0.5 * jnp.mean((pm - tm) ** 2)
    assert jnp.allclose(lm, ref_m, rtol=1e-4, atol=1e-4)

    print("KERNEL_OK")
</pallas_src>

<mosaic_0001>
module attributes {stable_mosaic.version = 11 : i64} {
  func.func @kernel(%arg0: i32, %arg1: i32, %arg2: memref<16x128xf32, #tpu.memory_space<vmem>>, %arg3: memref<1x8x128xf32, #tpu.memory_space<vmem>>, %arg4: memref<1x8x128xf32, #tpu.memory_space<vmem>>) attributes {dimension_semantics = [#tpu.dimension_semantics<parallel>, #tpu.dimension_semantics<arbitrary>], iteration_bounds = array<i64: 1, 1>, scalar_prefetch = 0 : i64, scratch_operands = 0 : i64, tpu.core_type = #tpu.core_type<tc>, window_params = [{transform_indices = @transform_0, window_bounds = array<i64: 16, 128>}, {transform_indices = @transform_1, window_bounds = array<i64: 1, 8, 128>}, {transform_indices = @transform_2, window_bounds = array<i64: 1, 8, 128>}]} {
    %c0_i32 = arith.constant 0 : i32
    %0 = arith.cmpi eq, %arg1, %c0_i32 : i32
    %1 = arith.extui %0 : i1 to i32
    %c0_i32_0 = arith.constant 0 : i32
    %2 = arith.cmpi ne, %1, %c0_i32_0 : i32
    scf.if %2 {
      %cst_16 = arith.constant 0.000000e+00 : f32
      %24 = vector.broadcast %cst_16 : f32 to vector<1x8x128xf32>
      %c0_17 = arith.constant 0 : index
      %c0_18 = arith.constant 0 : index
      %c0_19 = arith.constant 0 : index
      %25 = vector.load %arg3[%c0_17, %c0_18, %c0_19] : memref<1x8x128xf32, #tpu.memory_space<vmem>>, vector<1x8x128xf32>
      tpu.vector_store %arg3[%c0_17, %c0_18, %c0_19], %24 {strides = array<i32>} : memref<1x8x128xf32, #tpu.memory_space<vmem>>, vector<1x8x128xf32>,
      %cst_20 = arith.constant 0.000000e+00 : f32
      %26 = vector.broadcast %cst_20 : f32 to vector<1x8x128xf32>
      %c0_21 = arith.constant 0 : index
      %c0_22 = arith.constant 0 : index
      %c0_23 = arith.constant 0 : index
      %27 = vector.load %arg4[%c0_21, %c0_22, %c0_23] : memref<1x8x128xf32, #tpu.memory_space<vmem>>, vector<1x8x128xf32>
      tpu.vector_store %arg4[%c0_21, %c0_22, %c0_23], %26 {strides = array<i32>} : memref<1x8x128xf32, #tpu.memory_space<vmem>>, vector<1x8x128xf32>,
    } else {
    }
    %cst = arith.constant 0.000000e+00 : f32
    %3 = vector.broadcast %cst : f32 to vector<8x128xf32>
    %c0_i32_1 = arith.constant 0 : i32
    %c16_i32 = arith.constant 16 : i32
    %4 = arith.muli %c0_i32_1, %c16_i32 : i32
    %5 = tpu.assume_multiple %4, 16 : i32
    %6 = arith.index_cast %5 : i32 to index
    %c0 = arith.constant 0 : index
    %7 = vector.load %arg2[%6, %c0] : memref<16x128xf32, #tpu.memory_space<vmem>>, vector<16x128xf32>
    %8 = math.absf %7 : vector<16x128xf32>
    %9 = vector.shape_cast %8 : vector<16x128xf32> to vector<2x8x128xf32>
    %10 = arith.mulf %7, %7 : vector<16x128xf32>
    %11 = vector.shape_cast %10 : vector<16x128xf32> to vector<2x8x128xf32>
    %cst_2 = arith.constant dense<0.000000e+00> : vector<8x128xf32>
    %12 = vector.multi_reduction <add>, %9, %cst_2 [0] : vector<2x8x128xf32> to vector<8x128xf32>
    %13 = arith.addf %3, %12 : vector<8x128xf32>
    %cst_3 = arith.constant dense<0.000000e+00> : vector<8x128xf32>
    %14 = vector.multi_reduction <add>, %11, %cst_3 [0] : vector<2x8x128xf32> to vector<8x128xf32>
    %15 = arith.addf %3, %14 : vector<8x128xf32>
    %c1_i32 = arith.constant 1 : i32
    %c0_4 = arith.constant 0 : index
    %c0_5 = arith.constant 0 : index
    %c0_6 = arith.constant 0 : index
    %16 = vector.load %arg3[%c0_4, %c0_5, %c0_6] : memref<1x8x128xf32, #tpu.memory_space<vmem>>, vector<1x8x128xf32>
    %17 = vector.shape_cast %13 : vector<8x128xf32> to vector<1x8x128xf32>
    %18 = arith.addf %16, %17 : vector<1x8x128xf32>
    %c0_7 = arith.constant 0 : index
    %c0_8 = arith.constant 0 : index
    %c0_9 = arith.constant 0 : index
    %19 = vector.load %arg3[%c0_7, %c0_8, %c0_9] : memref<1x8x128xf32, #tpu.memory_space<vmem>>, vector<1x8x128xf32>
    tpu.vector_store %arg3[%c0_7, %c0_8, %c0_9], %18 {strides = array<i32>} : memref<1x8x128xf32, #tpu.memory_space<vmem>>, vector<1x8x128xf32>,
    %c0_10 = arith.constant 0 : index
    %c0_11 = arith.constant 0 : index
    %c0_12 = arith.constant 0 : index
    %20 = vector.load %arg4[%c0_10, %c0_11, %c0_12] : memref<1x8x128xf32, #tpu.memory_space<vmem>>, vector<1x8x128xf32>
    %21 = vector.shape_cast %15 : vector<8x128xf32> to vector<1x8x128xf32>
    %22 = arith.addf %20, %21 : vector<1x8x128xf32>
    %c0_13 = arith.constant 0 : index
    %c0_14 = arith.constant 0 : index
    %c0_15 = arith.constant 0 : index
    %23 = vector.load %arg4[%c0_13, %c0_14, %c0_15] : memref<1x8x128xf32, #tpu.memory_space<vmem>>, vector<1x8x128xf32>
    tpu.vector_store %arg4[%c0_13, %c0_14, %c0_15], %22 {strides = array<i32>} : memref<1x8x128xf32, #tpu.memory_space<vmem>>, vector<1x8x128xf32>,
    return
  }
  func.func @transform_0(%arg0: i32, %arg1: i32) -> (i32, i32) {
    %c1_i32 = arith.constant 1 : i32
    %0 = arith.muli %arg0, %c1_i32 : i32
    %1 = arith.addi %0, %arg1 : i32
    %c0_i32 = arith.constant 0 : i32
    %2 = arith.minsi %1, %c0_i32 : i32
    %c0_i32_0 = arith.constant 0 : i32
    %c0_i32_1 = arith.constant 0 : i32
    return %2, %c0_i32_0 : i32, i32
  }
  func.func @transform_1(%arg0: i32, %arg1: i32) -> (i32, i32, i32) {
    %c0_i32 = arith.constant 0 : i32
    %c0_i32_0 = arith.constant 0 : i32
    %c0_i32_1 = arith.constant 0 : i32
    return %arg0, %c0_i32, %c0_i32_0 : i32, i32, i32
  }
  func.func @transform_2(%arg0: i32, %arg1: i32) -> (i32, i32, i32) {
    %c0_i32 = arith.constant 0 : i32
    %c0_i32_0 = arith.constant 0 : i32
    %c0_i32_1 = arith.constant 0 : i32
    return %arg0, %c0_i32, %c0_i32_0 : i32, i32, i32
  }
}

module attributes {stable_mosaic.version = 11 : i64} {
  func.func @kernel(%arg0: i32, %arg1: i32, %arg2: memref<16x128xf32, #tpu.memory_space<vmem>>, %arg3: memref<16x128xf32, #tpu.memory_space<vmem>>, %arg4: memref<1x8x128xf32, #tpu.memory_space<vmem>>, %arg5: memref<1x8x128xf32, #tpu.memory_space<vmem>>) attributes {dimension_semantics = [#tpu.dimension_semantics<parallel>, #tpu.dimension_semantics<arbitrary>], iteration_bounds = array<i64: 1, 1>, scalar_prefetch = 0 : i64, scratch_operands = 0 : i64, tpu.core_type = #tpu.core_type<tc>, window_params = [{transform_indices = @transform_0, window_bounds = array<i64: 16, 128>}, {transform_indices = @transform_1, window_bounds = array<i64: 16, 128>}, {transform_indices = @transform_2, window_bounds = array<i64: 1, 8, 128>}, {transform_indices = @transform_3, window_bounds = array<i64: 1, 8, 128>}]} {
    %c0_i32 = arith.constant 0 : i32
    %0 = arith.cmpi eq, %arg1, %c0_i32 : i32
    %1 = arith.extui %0 : i1 to i32
    %c0_i32_0 = arith.constant 0 : i32
    %2 = arith.cmpi ne, %1, %c0_i32_0 : i32
    scf.if %2 {
      %cst_17 = arith.constant 0.000000e+00 : f32
      %27 = vector.broadcast %cst_17 : f32 to vector<1x8x128xf32>
      %c0_18 = arith.constant 0 : index
      %c0_19 = arith.constant 0 : index
      %c0_20 = arith.constant 0 : index
      %28 = vector.load %arg4[%c0_18, %c0_19, %c0_20] : memref<1x8x128xf32, #tpu.memory_space<vmem>>, vector<1x8x128xf32>
      tpu.vector_store %arg4[%c0_18, %c0_19, %c0_20], %27 {strides = array<i32>} : memref<1x8x128xf32, #tpu.memory_space<vmem>>, vector<1x8x128xf32>,
      %cst_21 = arith.constant 0.000000e+00 : f32
      %29 = vector.broadcast %cst_21 : f32 to vector<1x8x128xf32>
      %c0_22 = arith.constant 0 : index
      %c0_23 = arith.constant 0 : index
      %c0_24 = arith.constant 0 : index
      %30 = vector.load %arg5[%c0_22, %c0_23, %c0_24] : memref<1x8x128xf32, #tpu.memory_space<vmem>>, vector<1x8x128xf32>
      tpu.vector_store %arg5[%c0_22, %c0_23, %c0_24], %29 {strides = array<i32>} : memref<1x8x128xf32, #tpu.memory_space<vmem>>, vector<1x8x128xf32>,
    } else {
    }
    %cst = arith.constant 0.000000e+00 : f32
    %3 = vector.broadcast %cst : f32 to vector<8x128xf32>
    %c0_i32_1 = arith.constant 0 : i32
    %c16_i32 = arith.constant 16 : i32
    %4 = arith.muli %c0_i32_1, %c16_i32 : i32
    %5 = tpu.assume_multiple %4, 16 : i32
    %6 = arith.index_cast %5 : i32 to index
    %c0 = arith.constant 0 : index
    %7 = vector.load %arg2[%6, %c0] : memref<16x128xf32, #tpu.memory_space<vmem>>, vector<16x128xf32>
    %8 = arith.index_cast %5 : i32 to index
    %c0_2 = arith.constant 0 : index
    %9 = vector.load %arg3[%8, %c0_2] : memref<16x128xf32, #tpu.memory_space<vmem>>, vector<16x128xf32>
    %10 = arith.subf %7, %9 : vector<16x128xf32>
    %11 = math.absf %10 : vector<16x128xf32>
    %12 = vector.shape_cast %11 : vector<16x128xf32> to vector<2x8x128xf32>
    %13 = arith.mulf %10, %10 : vector<16x128xf32>
    %14 = vector.shape_cast %13 : vector<16x128xf32> to vector<2x8x128xf32>
    %cst_3 = arith.constant dense<0.000000e+00> : vector<8x128xf32>
    %15 = vector.multi_reduction <add>, %12, %cst_3 [0] : vector<2x8x128xf32> to vector<8x128xf32>
    %16 = arith.addf %3, %15 : vector<8x128xf32>
    %cst_4 = arith.constant dense<0.000000e+00> : vector<8x128xf32>
    %17 = vector.multi_reduction <add>, %14, %cst_4 [0] : vector<2x8x128xf32> to vector<8x128xf32>
    %18 = arith.addf %3, %17 : vector<8x128xf32>
    %c1_i32 = arith.constant 1 : i32
    %c0_5 = arith.constant 0 : index
    %c0_6 = arith.constant 0 : index
    %c0_7 = arith.constant 0 : index
    %19 = vector.load %arg4[%c0_5, %c0_6, %c0_7] : memref<1x8x128xf32, #tpu.memory_space<vmem>>, vector<1x8x128xf32>
    %20 = vector.shape_cast %16 : vector<8x128xf32> to vector<1x8x128xf32>
    %21 = arith.addf %19, %20 : vector<1x8x128xf32>
    %c0_8 = arith.constant 0 : index
    %c0_9 = arith.constant 0 : index
    %c0_10 = arith.constant 0 : index
    %22 = vector.load %arg4[%c0_8, %c0_9, %c0_10] : memref<1x8x128xf32, #tpu.memory_space<vmem>>, vector<1x8x128xf32>
    tpu.vector_store %arg4[%c0_8, %c0_9, %c0_10], %21 {strides = array<i32>} : memref<1x8x128xf32, #tpu.memory_space<vmem>>, vector<1x8x128xf32>,
    %c0_11 = arith.constant 0 : index
    %c0_12 = arith.constant 0 : index
    %c0_13 = arith.constant 0 : index
    %23 = vector.load %arg5[%c0_11, %c0_12, %c0_13] : memref<1x8x128xf32, #tpu.memory_space<vmem>>, vector<1x8x128xf32>
    %24 = vector.shape_cast %18 : vector<8x128xf32> to vector<1x8x128xf32>
    %25 = arith.addf %23, %24 : vector<1x8x128xf32>
    %c0_14 = arith.constant 0 : index
    %c0_15 = arith.constant 0 : index
    %c0_16 = arith.constant 0 : index
    %26 = vector.load %arg5[%c0_14, %c0_15, %c0_16] : memref<1x8x128xf32, #tpu.memory_space<vmem>>, vector<1x8x128xf32>
    tpu.vector_store %arg5[%c0_14, %c0_15, %c0_16], %25 {strides = array<i32>} : memref<1x8x128xf32, #tpu.memory_space<vmem>>, vector<1x8x128xf32>,
    return
  }
  func.func @transform_0(%arg0: i32, %arg1: i32) -> (i32, i32) {
    %c1_i32 = arith.constant 1 : i32
    %0 = arith.muli %arg0, %c1_i32 : i32
    %1 = arith.addi %0, %arg1 : i32
    %c0_i32 = arith.constant 0 : i32
    %2 = arith.minsi %1, %c0_i32 : i32
    %c0_i32_0 = arith.constant 0 : i32
    %c0_i32_1 = arith.constant 0 : i32
    return %2, %c0_i32_0 : i32, i32
  }
  func.func @transform_1(%arg0: i32, %arg1: i32) -> (i32, i32) {
    %c1_i32 = arith.constant 1 : i32
    %0 = arith.muli %arg0, %c1_i32 : i32
    %1 = arith.addi %0, %arg1 : i32
    %c0_i32 = arith.constant 0 : i32
    %2 = arith.minsi %1, %c0_i32 : i32
    %c0_i32_0 = arith.constant 0 : i32
    %c0_i32_1 = arith.constant 0 : i32
    return %2, %c0_i32_0 : i32, i32
  }
  func.func @transform_2(%arg0: i32, %arg1: i32) -> (i32, i32, i32) {
    %c0_i32 = arith.constant 0 : i32
    %c0_i32_0 = arith.constant 0 : i32
    %c0_i32_1 = arith.constant 0 : i32
    return %arg0, %c0_i32, %c0_i32_0 : i32, i32, i32
  }
  func.func @transform_3(%arg0: i32, %arg1: i32) -> (i32, i32, i32) {
    %c0_i32 = arith.constant 0 : i32
    %c0_i32_0 = arith.constant 0 : i32
    %c0_i32_1 = arith.constant 0 : i32
    return %arg0, %c0_i32, %c0_i32_0 : i32, i32, i32
  }
}

</mosaic_0001>

<bundles_post_ra>
// kernel: custom_loss.3
= control target key start
LH: loop header
LB: loop body
LE: loop exit
PB: predicated region body
PF: predicated region fallthrough
CT: control target
= control target key end

     0   :  { %s106_s0 = inlined_call_operand.vmem [shape: f32[16,128], index: 0, kind: input, shape index: {}]   ;;  %s107_s1 = inlined_call_operand.vmem [shape: f32[1,8,128], index: 1, kind: output, shape index: {0}]   ;;  %s108_s2 = inlined_call_operand.vmem [shape: f32[1,8,128], index: 2, kind: output, shape index: {1}]  }
   0x1   :  { %v48_v0 = vld [vmem:[%s106_s0] sm:$0xff]  ;;  %v49_v1 = vld [vmem:[%s106_s0 + $0x8] sm:$0xff] }
   0x2   :  { %v50_v2 = vand.u32 2147483647, %v48_v0  ;;  %v51_v3 = vand.u32 2147483647, %v49_v1  ;;  %v52_v4 = vmul.f32 %v48_v0, %v48_v0  ;;  %v53_v5 = vmul.f32 %v49_v1, %v49_v1 }
   0x4   :  { %v54_v6 = vadd.f32 %v51_v3, %v50_v2  ;;  %v56_v7 = vadd.f32 %v53_v5, %v52_v4 }
   0x6   :  { %60 = vst [vmem:[%s107_s1] sm:$0xff] %v54_v6  ;;  %63 = vst [vmem:[%s108_s2] sm:$0xff] %v56_v7 }

// kernel: custom_loss.2
= control target key start
LH: loop header
LB: loop body
LE: loop exit
PB: predicated region body
PF: predicated region fallthrough
CT: control target
= control target key end

     0   :  { %s162_s0 = inlined_call_operand.vmem [shape: f32[16,128], index: 0, kind: input, shape index: {}]   ;;  %s163_s1 = inlined_call_operand.vmem [shape: f32[16,128], index: 1, kind: input, shape index: {}]   ;;  %s164_s2 = inlined_call_operand.vmem [shape: f32[1,8,128], index: 2, kind: output, shape index: {0}]   ;;  %s165_s3 = inlined_call_operand.vmem [shape: f32[1,8,128], index: 3, kind: output, shape index: {1}]  }
   0x1   :  { %v83_v0 = vld [vmem:[%s162_s0] sm:$0xff]  ;;  %v84_v1 = vld [vmem:[%s162_s0 + $0x8] sm:$0xff] }
   0x2   :  { %v85_v2 = vld [vmem:[%s163_s1] sm:$0xff]  ;;  %v86_v3 = vld [vmem:[%s163_s1 + $0x8] sm:$0xff] }
   0x3   :  { %v87_v4 = vsub.f32 %v83_v0, %v85_v2  ;;  %v88_v5 = vsub.f32 %v84_v1, %v86_v3 }
   0x5   :  { %v89_v6 = vand.u32 2147483647, %v87_v4  ;;  %v91_v7 = vmul.f32 %v87_v4, %v87_v4  ;;  %v90_v8 = vand.u32 2147483647, %v88_v5  ;;  %v92_v9 = vmul.f32 %v88_v5, %v88_v5 }
   0x7   :  { %v93_v10 = vadd.f32 %v90_v8, %v89_v6  ;;  %v95_v11 = vadd.f32 %v92_v9, %v91_v7 }
   0x9   :  { %99 = vst [vmem:[%s164_s2] sm:$0xff] %v93_v10  ;;  %102 = vst [vmem:[%s165_s3] sm:$0xff] %v95_v11 }

</bundles_post_ra>
